<compile_context>
chip_gen: v7x
topology: tpu7x:2x2x1
jax: 0.10.0
libtpu: 0.0.40
codegen_flags: <defaults>
</compile_context>

<pallas_src>
import functools

import jax
import jax.numpy as jnp
from jax.experimental import pallas as pl
from jax.experimental.pallas import tpu as pltpu


def _round_up(x, m):
    return ((x + m - 1) // m) * m


def _vmem_capacity_bytes():
    """Physical VMEM per core (only used for generation-gated tile sizing)."""
    try:
        info = pltpu.get_tpu_info()
        return int(getattr(info, "vmem_capacity_bytes", 64 << 20))
    except Exception:
        # Non-TPU tracing / API drift: assume the small-VMEM part (conservative).
        return 64 << 20


def _chained_sum_kernel(x_ref, o_ref, acc_ref, *, a_tile, a_total, acc_dtype):
    # x_ref : (a_tile, b_tile, C, D, E) input block
    # o_ref : (b_tile, D) output block, resident across the A (reduction) axis
    # acc_ref: (b_tile, D, E) accumulator scratch (f32 / i32)
    a_idx = pl.program_id(1)
    last_a = pl.num_programs(1) - 1

    @pl.when(a_idx == 0)
    def _():
        acc_ref[...] = jnp.zeros_like(acc_ref)

    tail = a_total % a_tile  # static Python int

    if tail == 0:
        # A divides evenly: every block is full.
        acc_ref[...] += jnp.sum(x_ref[...], axis=(0, 2), dtype=acc_dtype)
    else:
        is_tail = a_idx == last_a

        @pl.when(jnp.logical_not(is_tail))
        def _():
            acc_ref[...] += jnp.sum(x_ref[...], axis=(0, 2), dtype=acc_dtype)

        @pl.when(is_tail)
        def _():
            # Ragged last block along A: only accumulate its valid rows.
            # `tail` is a compile-time constant, so this is a static slice.
            acc_ref[...] += jnp.sum(
                x_ref[pl.ds(0, tail)], axis=(0, 2), dtype=acc_dtype)

    @pl.when(a_idx == last_a)
    def _():
        # Single cross-lane (E) reduce + single lane-sparse (b_tile, D) store,
        # outside the hot loop.
        o_ref[...] = jnp.sum(acc_ref[...], axis=-1).astype(o_ref.dtype)


def chained_sum(x, *, target_tile_bytes=None):
    """Implements sum(sum(sum(x, 0), 1), 2) for a rank-5 array x."""
    if x.ndim != 5:
        raise ValueError(f"chained_sum expects a rank-5 input, got shape {x.shape}")
    A, B, C, D, E = x.shape
    itemsize = jnp.dtype(x.dtype).itemsize
    acc_dtype = jnp.float32 if jnp.issubdtype(x.dtype, jnp.inexact) else jnp.int32

    # --- Generation-gated sizing --------------------------------------------
    vmem_cap = _vmem_capacity_bytes()
    big_vmem = vmem_cap >= (100 << 20)          # v5e / v6e: 128 MiB physical
    if target_tile_bytes is None:
        target_tile_bytes = (24 << 20) if big_vmem else (8 << 20)
    vmem_limit_cap = (96 << 20) if big_vmem else (48 << 20)

    # Mosaic pads the last two dims of a VMEM block: sublane dim (D) to the
    # dtype sublane multiple, lane dim (E) to a multiple of 128.
    sublanes = max(1, 32 // itemsize)           # 8 f32 / 16 bf16 / 32 int8
    pad_d_in = _round_up(D, sublanes)
    pad_e = _round_up(E, 128)

    # --- Pick b_tile: kept axis, leading 'parallel' grid dimension -----------
    # Enables the dual-TensorCore split on v7x and bounds accumulator VMEM for
    # large B*D*E.  Candidates keep the (b_tile, D) output block legal:
    # b_tile == B, or b_tile a multiple of 8 that divides B.
    acc_row_bytes = _round_up(D, 8) * pad_e * 4   # one b-row of the accumulator
    acc_budget = 8 << 20
    candidates = [B] + [t for t in range(8, B, 8) if B % t == 0]

    def _b_score(t):
        fits = (t * acc_row_bytes) <= acc_budget
        splits = (B // t) >= 2                    # >=2 tiles -> megacore split
        return (fits, splits, t)

    b_tile = max(candidates, key=_b_score)
    n_b = B // b_tile

    # --- Pick a_tile: largest multi-MiB contiguous slab along A --------------
    slice_bytes = b_tile * C * pad_d_in * pad_e * itemsize  # one A-row (padded)
    a_tile = max(1, min(A, target_tile_bytes // slice_bytes))
    n_a = pl.cdiv(A, a_tile)

    # --- VMEM budget from the padded layout -----------------------------------
    in_tile_bytes = a_tile * slice_bytes
    acc_bytes = b_tile * acc_row_bytes
    out_bytes = _round_up(b_tile, sublanes) * _round_up(D, 128) * itemsize
    vmem_limit = 2 * in_tile_bytes + acc_bytes + 2 * out_bytes + (4 << 20)
    vmem_limit = int(min(max(vmem_limit, 16 << 20), vmem_limit_cap))

    kernel = functools.partial(
        _chained_sum_kernel, a_tile=a_tile, a_total=A, acc_dtype=acc_dtype)

    return pl.pallas_call(
        kernel,
        out_shape=jax.ShapeDtypeStruct((B, D), x.dtype),
        grid=(n_b, n_a),
        in_specs=[
            pl.BlockSpec(
                (a_tile, b_tile, C, D, E),
                lambda b, a: (a, b, 0, 0, 0),
            )
        ],
        out_specs=pl.BlockSpec((b_tile, D), lambda b, a: (b, 0)),
        scratch_shapes=[pltpu.VMEM((b_tile, D, E), acc_dtype)],
        compiler_params=pltpu.CompilerParams(
            dimension_semantics=("parallel", "arbitrary"),
            vmem_limit_bytes=vmem_limit,
        ),
    )(x)


if __name__ == "__main__":
    key = jax.random.PRNGKey(0)
    k1, k2 = jax.random.split(key)

    # --- Test 1: small rank-5 input; whole A fits in one tile (single A step).
    x = jax.random.normal(k1, (2, 4, 3, 8, 128), dtype=jnp.float32)
    out = chained_sum(x)
    jax.block_until_ready(out)
    ref = jnp.sum(jnp.sum(jnp.sum(x, axis=0), axis=1), axis=2)
    assert out.shape == ref.shape == (4, 8), (out.shape, ref.shape)
    assert jnp.allclose(out, ref, atol=1e-4, rtol=1e-4)

    # --- Test 2: non-dividing A (cdiv grid + ragged tail block) plus a
    #     multi-step accumulation loop (target sized so a_tile == 2 for A == 5).
    x2 = jax.random.normal(k2, (5, 4, 3, 8, 128), dtype=jnp.float32)
    out2 = chained_sum(x2, target_tile_bytes=2 * (4 * 3 * 8 * 128 * 4))
    jax.block_until_ready(out2)
    ref2 = jnp.sum(jnp.sum(jnp.sum(x2, axis=0), axis=1), axis=2)
    assert out2.shape == ref2.shape == (4, 8), (out2.shape, ref2.shape)
    assert jnp.allclose(out2, ref2, atol=1e-4, rtol=1e-4)

    print("KERNEL_OK")
</pallas_src>

<mosaic_0001>
module attributes {stable_mosaic.version = 11 : i64} {
  func.func @_chained_sum_kernel(%arg0: i32, %arg1: i32, %arg2: memref<2x4x3x8x128xf32, #tpu.memory_space<vmem>>, %arg3: memref<4x8xf32, #tpu.memory_space<vmem>>, %arg4: memref<4x8x128xf32, #tpu.memory_space<vmem>>) attributes {dimension_semantics = [#tpu.dimension_semantics<parallel>, #tpu.dimension_semantics<arbitrary>], iteration_bounds = array<i64: 1, 1>, scalar_prefetch = 0 : i64, scratch_operands = 1 : i64, tpu.core_type = #tpu.core_type<tc>, window_params = [{transform_indices = @transform_0, window_bounds = array<i64: 2, 4, 3, 8, 128>}, {transform_indices = @transform_1, window_bounds = array<i64: 4, 8>}]} {
    %c0_i32 = arith.constant 0 : i32
    %0 = arith.cmpi eq, %arg1, %c0_i32 : i32
    %1 = arith.extui %0 : i1 to i32
    %c0_i32_0 = arith.constant 0 : i32
    %2 = arith.cmpi ne, %1, %c0_i32_0 : i32
    scf.if %2 {
      %cst_13 = arith.constant 0.000000e+00 : f32
      %11 = vector.broadcast %cst_13 : f32 to vector<4x8x128xf32>
      %c0_14 = arith.constant 0 : index
      %c0_15 = arith.constant 0 : index
      %c0_16 = arith.constant 0 : index
      %12 = vector.load %arg4[%c0_14, %c0_15, %c0_16] : memref<4x8x128xf32, #tpu.memory_space<vmem>>, vector<4x8x128xf32>
      tpu.vector_store %arg4[%c0_14, %c0_15, %c0_16], %11 {strides = array<i32>} : memref<4x8x128xf32, #tpu.memory_space<vmem>>, vector<4x8x128xf32>,
    } else {
    }
    %c0 = arith.constant 0 : index
    %c0_1 = arith.constant 0 : index
    %c0_2 = arith.constant 0 : index
    %3 = vector.load %arg4[%c0, %c0_1, %c0_2] : memref<4x8x128xf32, #tpu.memory_space<vmem>>, vector<4x8x128xf32>
    %c0_3 = arith.constant 0 : index
    %c0_4 = arith.constant 0 : index
    %c0_5 = arith.constant 0 : index
    %c0_6 = arith.constant 0 : index
    %c0_7 = arith.constant 0 : index
    %4 = vector.load %arg2[%c0_3, %c0_4, %c0_5, %c0_6, %c0_7] : memref<2x4x3x8x128xf32, #tpu.memory_space<vmem>>, vector<2x4x3x8x128xf32>
    %cst = arith.constant dense<0.000000e+00> : vector<4x8x128xf32>
    %5 = vector.multi_reduction <add>, %4, %cst [0, 2] : vector<2x4x3x8x128xf32> to vector<4x8x128xf32>
    %6 = arith.addf %3, %5 : vector<4x8x128xf32>
    %c0_8 = arith.constant 0 : index
    %c0_9 = arith.constant 0 : index
    %c0_10 = arith.constant 0 : index
    %7 = vector.load %arg4[%c0_8, %c0_9, %c0_10] : memref<4x8x128xf32, #tpu.memory_space<vmem>>, vector<4x8x128xf32>
    tpu.vector_store %arg4[%c0_8, %c0_9, %c0_10], %6 {strides = array<i32>} : memref<4x8x128xf32, #tpu.memory_space<vmem>>, vector<4x8x128xf32>,
    %c0_i32_11 = arith.constant 0 : i32
    %8 = arith.cmpi eq, %arg1, %c0_i32_11 : i32
    %9 = arith.extui %8 : i1 to i32
    %c0_i32_12 = arith.constant 0 : i32
    %10 = arith.cmpi ne, %9, %c0_i32_12 : i32
    scf.if %10 {
      %c0_13 = arith.constant 0 : index
      %c0_14 = arith.constant 0 : index
      %c0_15 = arith.constant 0 : index
      %11 = vector.load %arg4[%c0_13, %c0_14, %c0_15] : memref<4x8x128xf32, #tpu.memory_space<vmem>>, vector<4x8x128xf32>
      %cst_16 = arith.constant dense<0.000000e+00> : vector<4x8xf32>
      %12 = vector.multi_reduction <add>, %11, %cst_16 [2] : vector<4x8x128xf32> to vector<4x8xf32>
      %c0_17 = arith.constant 0 : index
      %c0_18 = arith.constant 0 : index
      %13 = vector.load %arg3[%c0_17, %c0_18] : memref<4x8xf32, #tpu.memory_space<vmem>>, vector<4x8xf32>
      tpu.vector_store %arg3[%c0_17, %c0_18], %12 {strides = array<i32>} : memref<4x8xf32, #tpu.memory_space<vmem>>, vector<4x8xf32>,
    } else {
    }
    return
  }
  func.func @transform_0(%arg0: i32, %arg1: i32) -> (i32, i32, i32, i32, i32) {
    %c0_i32 = arith.constant 0 : i32
    %c0_i32_0 = arith.constant 0 : i32
    %c0_i32_1 = arith.constant 0 : i32
    %c0_i32_2 = arith.constant 0 : i32
    return %arg1, %arg0, %c0_i32, %c0_i32_0, %c0_i32_1 : i32, i32, i32, i32, i32
  }
  func.func @transform_1(%arg0: i32, %arg1: i32) -> (i32, i32) {
    %c0_i32 = arith.constant 0 : i32
    %c0_i32_0 = arith.constant 0 : i32
    return %arg0, %c0_i32 : i32, i32
  }
}

</mosaic_0001>

<bundles_post_ra>
// kernel: tpu_custom_call.1
= control target key start
LH: loop header
LB: loop body
LE: loop exit
PB: predicated region body
PF: predicated region fallthrough
CT: control target
= control target key end

     0   :  { %6 = vsyncpa [#allocation4], 0  ;;  %s238_s0 = inlined_call_operand.hbm [shape: f32[2,4,3,8,128], index: 0, kind: input, shape index: {}]   ;;  %s239_s1 = inlined_call_operand.hbm [shape: f32[4,8], index: 1, kind: output, shape index: {}]  }
   0x1   :  { %7 = vsyncpa [#allocation5], 0  ;;  %s200_s6 = smov [#allocation3]   ;;  %s152_s10 = scalar_lea.hbm %s238_s0, 3072 }
   0x2   :  { %s13_s7 = sshll.u32 %s200_s6, 4  ;;  %p153_p0 = scmp.ne.s32.totalorder %s238_s0, %s152_s10  ;;  %s14_s7 = int_to_ptr.vmem [resolvable:$true] %s13_s7 }
   0x3   :  { %p156_p1 = scmp.lt.u32.totalorder %s152_s10, %s238_s0 }
   0x5   :  { %p158_p2 = pnand %p156_p1, %p153_p0 }
   0x7   :  { %161 = shalt.err (!%p158_p2)
}
   0x8   :  { %s162_s15 = scalar_lea.vmem %s14_s7, 3072  ;;  %p167_p4 = scmp.lt.s32.totalorder %s14_s7, %s14_s7 }
   0x9   :  { %p163_p3 = scmp.ne.s32.totalorder %s14_s7, %s162_s15  ;;  %p168_p5 = scmp.lt.s32.totalorder %s162_s15, %s162_s15 }
   0xb   :  { %p169_p6 = por %p168_p5, %p167_p4 }
   0xd   :  { %p170_p7 = pnand %p169_p6, %p163_p3 }
   0xf   :  { %173 = shalt.err (!%p170_p7)
}
  0x10   :  { %s201_s16 = smov 128   ;;  %s202_s17 = smov 8  }
  0x11   :  { %19 = dma.hbm_to_vmem [thread:$0]  %s238_s0, 3072, %s14_s7, [#allocation4], %s201_s16, %s201_s16, %s202_s17  }
  0x12   :  { %196 = dma.done.wait [#allocation4], 3072  }
  0x13   :  { %197 = vsyncadd [#allocation4], 4294964224  ;;  %v35_v0 = vld [vmem:[#allocation3] sm:$0xff]  ;;  %v36_v1 = vld [vmem:[#allocation3 + $0x8] sm:$0xff]  ;;  %v106_v44 = vlaneseq  ;;  %vm124_vm0 = vcmask 1041409   ;;  %vm126_vm1 = vcmask 1042434  }
  0x14   :  { %v37_v2 = vld [vmem:[#allocation3 + $0x10] sm:$0xff]  ;;  %v47_v3 = vld [vmem:[#allocation3 + $0x60] sm:$0xff]  ;;  %v59_v4 = vadd.f32 %v36_v1, %v35_v0  ;;  %v42_v6 = vld [vmem:[#allocation3 + $0x38] sm:$0xff]  ;;  %s203_s0 = smov [#allocation6]   ;;  %vm128_vm2 = vcmask 1043459   ;;  %vm131_vm3 = vcmask 60416  }
  0x15   :  { %v41_v5 = vld [vmem:[#allocation3 + $0x30] sm:$0xff]  ;;  %v43_v7 = vld [vmem:[#allocation3 + $0x40] sm:$0xff]  ;;  %v48_v8 = vld [vmem:[#allocation3 + $0x68] sm:$0xff]  ;;  %v107_v45 = vand.u32 127, %v106_v44  ;;  %v109_v46 = vshrl.u32 %v106_v44, 7  ;;  %s139_s20 = sshll.u32 %s203_s0, 4  ;;  %s140_s20 = int_to_ptr.vmem [resolvable:$true] %s139_s20 }
  0x16   :  { %v60_v9 = vadd.f32 %v59_v4, %v37_v2  ;;  %v53_v10 = vld [vmem:[#allocation3 + $0x90] sm:$0xff]  ;;  %v69_v11 = vadd.f32 %v42_v6, %v41_v5  ;;  %v38_v12 = vld [vmem:[#allocation3 + $0x18] sm:$0xff]  ;;  %v39_v13 = vld [vmem:[#allocation3 + $0x20] sm:$0xff]  ;;  %s174_s21 = scalar_lea.vmem %s140_s20, 64  ;;  %p179_p9 = scmp.lt.s32.totalorder %s140_s20, %s140_s20 }
  0x17   :  { %v40_v14 = vld [vmem:[#allocation3 + $0x28] sm:$0xff]  ;;  %v49_v15 = vld [vmem:[#allocation3 + $0x70] sm:$0xff]  ;;  %v54_v17 = vld [vmem:[#allocation3 + $0x98] sm:$0xff]  ;;  %v64_v20 = vadd.f32 %v39_v13, %v38_v12  ;;  %v110_v48 = vsub.s32 %v107_v45, %v109_v46  ;;  %p175_p8 = scmp.ne.s32.totalorder %s140_s20, %s174_s21  ;;  %p180_p10 = scmp.lt.s32.totalorder %s174_s21, %s174_s21 }
  0x18   :  { %v61_v16 = vadd.f32 %v60_v9, %v47_v3  ;;  %v70_v18 = vadd.f32 %v69_v11, %v43_v7  ;;  %v50_v19 = vld [vmem:[#allocation3 + $0x78] sm:$0xff]  ;;  %v44_v21 = vld [vmem:[#allocation3 + $0x48] sm:$0xff]  ;;  %v45_v22 = vld [vmem:[#allocation3 + $0x50] sm:$0xff] }
  0x19   :  { %v46_v23 = vld [vmem:[#allocation3 + $0x58] sm:$0xff]  ;;  %v65_v26 = vadd.f32 %v64_v20, %v40_v14  ;;  %v74_v27 = vadd.f32 %v45_v22, %v44_v21  ;;  %v55_v28 = vld [vmem:[#allocation3 + $0xa0] sm:$0xff]  ;;  %v56_v30 = vld [vmem:[#allocation3 + $0xa8] sm:$0xff]  ;;  %p181_p11 = por %p180_p10, %p179_p9 }
  0x1a   :  { %v62_v24 = vadd.f32 %v61_v16, %v48_v8  ;;  %v71_v25 = vadd.f32 %v70_v18, %v53_v10  ;;  %v51_v29 = vld [vmem:[#allocation3 + $0x80] sm:$0xff]  ;;  %v52_v35 = vld [vmem:[#allocation3 + $0x88] sm:$0xff]  ;;  %v57_v36 = vld [vmem:[#allocation3 + $0xb0] sm:$0xff] }
  0x1b   :  { %v66_v33 = vadd.f32 %v65_v26, %v50_v19  ;;  %v75_v34 = vadd.f32 %v74_v27, %v46_v23  ;;  %v58_v40 = vld [vmem:[#allocation3 + $0xb8] sm:$0xff]  ;;  %p182_p12 = pnand %p181_p11, %p175_p8 }
  0x1c   :  { %v63_v31 = vadd.f32 %v62_v24, %v49_v15  ;;  %v72_v32 = vadd.f32 %v71_v25, %v54_v17 }
  0x1d   :  { %v67_v38 = vadd.f32 %v66_v33, %v51_v29  ;;  %v76_v39 = vadd.f32 %v75_v34, %v56_v30 }
  0x1e   :  { %94 = vadd.xlane.f32.xlu0 %v63_v31  ;;  %v73_v37 = vadd.f32 %v72_v32, %v55_v28 }
  0x1f   :  { %v68_v41 = vadd.f32 %v67_v38, %v52_v35  ;;  %v77_v42 = vadd.f32 %v76_v39, %v57_v36 }
  0x20   :  { %98 = vadd.xlane.f32.xlu1 %v73_v37 }
  0x21   :  { %v78_v43 = vadd.f32 %v77_v42, %v58_v40 }
  0x22   :  { %96 = vadd.xlane.f32.xlu0 %v68_v41 }
  0x24   :  { %100 = vadd.xlane.f32.xlu1 %v78_v43 }
  0xab   :  { %v95_v47 = vpop.xlane.xlu0 %94 }
  0xac   :  { %v111_v51 = vrot.slane %v95_v47, %v110_v48 }
  0xad   :  { %v99_v49 = vpop.xlane.xlu1 %98 }
  0xae   :  { %v119_v53 = vrot.slane %v99_v49, %v110_v48 }
  0xaf   :  { %v97_v50 = vpop.xlane.xlu0 %96 }
  0xb0   :  { %v115_v52 = vrot.slane %v97_v50, %v110_v48 }
  0xb1   :  { %v101_v54 = vpop.xlane.xlu1 %100 }
  0xb2   :  { %v125_v55 = vsel %vm124_vm0, %v115_v52, %v111_v51  ;;  %v123_v56 = vrot.slane %v101_v54, %v110_v48 }
  0xb3   :  { %v127_v57 = vsel %vm126_vm1, %v119_v53, %v125_v55 }
  0xb4   :  { %v129_v58 = vsel %vm128_vm2, %v123_v56, %v127_v57 }
  0xb5   :  { %132 = vst.msk [vmem:[#allocation6] sm:$0xf] %vm131_vm3, %v129_v58 }
  0xb6   :  { %185 = shalt.err (!%p182_p12)
}
  0xb7   :  { %s186_s24 = scalar_lea.hbm %s239_s1, 64 }
  0xb8   :  { %p187_p13 = scmp.ne.s32.totalorder %s239_s1, %s186_s24  ;;  %p190_p0 = scmp.lt.u32.totalorder %s186_s24, %s239_s1 }
  0xba   :  { %p192_p1 = pnand %p190_p0, %p187_p13 }
  0xbc   :  { %195 = shalt.err (!%p192_p1)
}
  0xbd   :  { %142 = dma.vmem_to_hbm [thread:$0]  %s140_s20, 64, %s239_s1, [#allocation5]  }
  0xbe   :  { %198 = dma.done.wait [#allocation5], 64  }
  0xbf   :  { %199 = vsyncadd [#allocation5], 4294967232 }
  0xc0   :  { %146 = vsyncpa [#allocation4], 1 }
  0xc1   :  { %147 = vsyncpa [#allocation5], 1 }

</bundles_post_ra>
